<compile_context>
chip_gen: v5e
topology: v5e:2x2
jax: 0.10.0
libtpu: 0.0.40
codegen_flags: <defaults>
</compile_context>

<pallas_src>
import functools

import jax
import jax.numpy as jnp
from jax import lax
from jax.experimental import pallas as pl
from jax.experimental.pallas import tpu as pltpu


# ----------------------------------------------------------------------------- kernel

def _spectral_mac_kernel(xr_ref, xi_ref, wr_ref, wi_ref, or_ref, oi_ref,
                         *, B, Ci, tCo):
    """One (lane-chunk, Co-tile) grid step.

    xr/xi : (B*Ci, tL)    corner spectrum, row = b*Ci + i (resident per lane chunk)
    wr/wi : (Ci, tCo, tL) weights for this Co tile, sublane axis = output channels
    or/oi : (B, tCo, tL)  output real / imag

    The sublane axis of every vreg carries 8 output channels, so every VALU op is
    fully utilized regardless of batch size; x rows broadcast over those sublanes.
    """
    tL = xr_ref.shape[-1]
    n_groups = tCo // 8

    def process(b, g):
        o0 = g * 8
        if not isinstance(o0, int):                     # dynamic group index
            o0 = pl.multiple_of(o0, 8)                  # keep stores full-tile aligned

        def mac(i, carry):
            acc_r, acc_i = carry
            row = b * Ci + i
            xr = xr_ref[pl.ds(row, 1), :]               # (1, tL) -> sublane broadcast
            xi_ = xi_ref[pl.ds(row, 1), :]
            wr = wr_ref[i, pl.ds(o0, 8), :]             # (8, tL) sublane-dense weights
            wi_ = wi_ref[i, pl.ds(o0, 8), :]
            # standard complex MAC: (xr + i*xi)(wr + i*wi)
            acc_r = acc_r + (xr * wr - xi_ * wi_)
            acc_i = acc_i + (xr * wi_ + xi_ * wr)
            return acc_r, acc_i

        acc0 = (jnp.zeros((8, tL), jnp.float32), jnp.zeros((8, tL), jnp.float32))
        if Ci <= 16:
            acc_r, acc_i = acc0
            for i in range(Ci):                         # static unroll, static offsets
                acc_r, acc_i = mac(i, (acc_r, acc_i))
        else:                                           # bounded live ranges for big Ci
            acc_r, acc_i = lax.fori_loop(0, Ci, mac, acc0, unroll=2)

        or_ref[b, pl.ds(o0, 8), :] = acc_r              # full (8, tL) aligned stores
        oi_ref[b, pl.ds(o0, 8), :] = acc_i

    if B * n_groups <= 32:
        for b in range(B):                              # B, n_groups small: static
            for g in range(n_groups):
                process(b, g)
    else:
        # large batch x wide Co tile: bound code size / live ranges with fori_loop
        def body(t, carry):
            process(t // n_groups, t % n_groups)
            return carry
        lax.fori_loop(0, B * n_groups, body, 0)


# ------------------------------------------------------------------------- tile picker

def _vmem_bytes(B, Ci, tCo, tL):
    x_b = 2 * 2 * (B * Ci) * tL * 4      # xr, xi   (double-buffered by the pipeline)
    w_b = 2 * 2 * Ci * tCo * tL * 4      # wr, wi   (streamed per Co tile)
    o_b = 2 * 2 * B * tCo * tL * 4       # out_r, out_i
    return x_b + w_b + o_b


def _vmem_budget():
    """(tile budget, physical VMEM capacity) — queried from the device when possible."""
    cap = 64 << 20                        # conservative default (v7x per-TC VMEM)
    try:
        info = pltpu.get_tpu_info()
        cap = int(getattr(info, "vmem_capacity_bytes", cap))
    except Exception:
        pass
    return int(cap * 0.55), cap           # ~70 MiB on v5e/v6e, ~35 MiB on v7x


def _pick_tiles(B, Ci, Co_pad, L_pad, budget_bytes):
    # Output-channel tile: multiple of 8 dividing Co_pad, capped at 32 so the
    # in-kernel group loop stays small; prefer >= 4 Co grid steps, then >= 2.
    co_cands = [t for t in range(8, min(Co_pad, 32) + 1, 8) if Co_pad % t == 0]
    tCo = co_cands[0]                     # 8 always divides Co_pad
    for min_steps in (4, 2, 1):
        ok = [t for t in co_cands if Co_pad // t >= min_steps]
        if ok:
            tCo = max(ok)
            break

    # Lane chunk: largest multiple of 128 dividing L_pad (capped at 1024 so the two
    # (8, tL) f32 accumulators stay comfortably inside the vreg file) that fits VMEM.
    l_cands = sorted((t for t in range(128, L_pad + 1, 128)
                      if L_pad % t == 0 and t <= 1024), reverse=True)
    tL = l_cands[-1]                      # 128 always divides L_pad
    for t in l_cands:
        if _vmem_bytes(B, Ci, tCo, t) <= budget_bytes:
            tL = t
            break

    # Guarantee >= 2 grid steps (pipelining + v7x dual-TC sharding) whenever possible.
    if (Co_pad // tCo) * (L_pad // tL) < 2:
        smaller = [t for t in l_cands if t < tL]
        if smaller:
            tL = smaller[0]
    return tCo, tL


# --------------------------------------------------------------------------- pallas op

def _compl_mul_lanes(xr, xi, wr, wi, *, B, Ci, Co_pad):
    """xr/xi: (B*Ci, L_pad); wr/wi: (Ci, Co_pad, L_pad) -> (B, Co_pad, L_pad) re, im."""
    L_pad = xr.shape[-1]
    budget, cap = _vmem_budget()
    tCo, tL = _pick_tiles(B, Ci, Co_pad, L_pad, budget)
    n_co = Co_pad // tCo
    n_l = L_pad // tL

    est = _vmem_bytes(B, Ci, tCo, tL)
    vmem_limit = int(min(max(est + (4 << 20), 16 << 20), int(cap * 0.85)))

    kernel = functools.partial(_spectral_mac_kernel, B=B, Ci=Ci, tCo=tCo)

    # Grid: lane chunks outer (slow), Co tiles inner (fast) -> the x chunk stays
    # resident in VMEM across the whole sweep over Co tiles; only weights stream.
    grid = (n_l, n_co)
    in_specs = [
        pl.BlockSpec((B * Ci, tL), lambda l, j: (0, l)),       # xr (resident per l)
        pl.BlockSpec((B * Ci, tL), lambda l, j: (0, l)),       # xi (resident per l)
        pl.BlockSpec((Ci, tCo, tL), lambda l, j: (0, j, l)),   # wr (streamed)
        pl.BlockSpec((Ci, tCo, tL), lambda l, j: (0, j, l)),   # wi (streamed)
    ]
    out_specs = [
        pl.BlockSpec((B, tCo, tL), lambda l, j: (0, j, l)),
        pl.BlockSpec((B, tCo, tL), lambda l, j: (0, j, l)),
    ]
    out_shape = [
        jax.ShapeDtypeStruct((B, Co_pad, L_pad), jnp.float32),
        jax.ShapeDtypeStruct((B, Co_pad, L_pad), jnp.float32),
    ]
    out_r, out_i = pl.pallas_call(
        kernel,
        grid=grid,
        in_specs=in_specs,
        out_specs=out_specs,
        out_shape=out_shape,
        compiler_params=pltpu.CompilerParams(
            dimension_semantics=("parallel", "parallel"),
            vmem_limit_bytes=vmem_limit,
        ),
    )(xr, xi, wr, wi)
    return out_r, out_i


# ----------------------------------------------------------------------------- wrapper

@functools.partial(jax.jit, static_argnames=("modes1", "modes2", "modes3"))
def spectral_conv3d(x, w1, w2, w3, w4, *, modes1, modes2, modes3):
    """Forward pass of SpectralConv3d.

    x : (B, Ci, D1, D2, D3) float32
    w1..w4 : (Ci, Co, m1, m2, m3) complex64
    returns (B, Co, D1, D2, D3) float32
    """
    B, Ci, D1, D2, D3 = x.shape
    Co = w1.shape[1]
    m1, m2, m3 = modes1, modes2, modes3
    D3h = D3 // 2 + 1
    assert m1 <= D1 and m2 <= D2 and m3 <= D3h, "modes exceed spectrum size"

    L = 4 * m1 * m2 * m3                          # 4 corners folded onto the lane axis
    L_pad = ((L + 127) // 128) * 128
    Co_pad = ((Co + 7) // 8) * 8                  # sublane-group padding

    x_ft = jnp.fft.rfftn(x, axes=(-3, -2, -1))    # (B, Ci, D1, D2, D3h) complex64

    # Gather the 4 retained-mode corner blocks and fold them into the lane axis.
    corners = jnp.stack(
        [
            x_ft[:, :, :m1, :m2, :m3],
            x_ft[:, :, -m1:, :m2, :m3],
            x_ft[:, :, :m1, -m2:, :m3],
            x_ft[:, :, -m1:, -m2:, :m3],
        ],
        axis=2,
    )                                             # (B, Ci, 4, m1, m2, m3)
    xc = corners.reshape(B * Ci, L)               # row = b*Ci + i
    xr = jnp.real(xc).astype(jnp.float32)
    xi = jnp.imag(xc).astype(jnp.float32)

    w = jnp.stack([w1, w2, w3, w4], axis=2)       # (Ci, Co, 4, m1, m2, m3)
    wc = w.reshape(Ci, Co, L)
    wr = jnp.real(wc).astype(jnp.float32)
    wi = jnp.imag(wc).astype(jnp.float32)

    if L_pad != L:                                # lane pad (multiple of 128)
        xr = jnp.pad(xr, ((0, 0), (0, L_pad - L)))
        xi = jnp.pad(xi, ((0, 0), (0, L_pad - L)))
    if L_pad != L or Co_pad != Co:                # sublane + lane pad on weights
        wpad = ((0, 0), (0, Co_pad - Co), (0, L_pad - L))
        wr = jnp.pad(wr, wpad)
        wi = jnp.pad(wi, wpad)

    out_r, out_i = _compl_mul_lanes(xr, xi, wr, wi, B=B, Ci=Ci, Co_pad=Co_pad)

    out = (out_r[:, :Co, :L] + 1j * out_i[:, :Co, :L]).astype(jnp.complex64)
    out = out.reshape(B, Co, 4, m1, m2, m3)

    # Scatter the 4 blocks back into the (zero-initialized) full spectrum.
    out_ft = jnp.zeros((B, Co, D1, D2, D3h), jnp.complex64)
    out_ft = out_ft.at[:, :, :m1, :m2, :m3].set(out[:, :, 0])
    out_ft = out_ft.at[:, :, -m1:, :m2, :m3].set(out[:, :, 1])
    out_ft = out_ft.at[:, :, :m1, -m2:, :m3].set(out[:, :, 2])
    out_ft = out_ft.at[:, :, -m1:, -m2:, :m3].set(out[:, :, 3])

    y = jnp.fft.irfftn(out_ft, s=(D1, D2, D3), axes=(-3, -2, -1))
    return y.astype(jnp.float32)


# --------------------------------------------------------------------------- reference

def _reference(x, w1, w2, w3, w4, m1, m2, m3):
    """Pure-JAX reference (mirrors the PyTorch forward)."""
    B, Ci, D1, D2, D3 = x.shape
    Co = w1.shape[1]
    x_ft = jnp.fft.rfftn(x, axes=(-3, -2, -1))
    out_ft = jnp.zeros((B, Co, D1, D2, D3 // 2 + 1), jnp.complex64)
    mul = lambda a, w: jnp.einsum("bixyz,ioxyz->boxyz", a, w)
    out_ft = out_ft.at[:, :, :m1, :m2, :m3].set(mul(x_ft[:, :, :m1, :m2, :m3], w1))
    out_ft = out_ft.at[:, :, -m1:, :m2, :m3].set(mul(x_ft[:, :, -m1:, :m2, :m3], w2))
    out_ft = out_ft.at[:, :, :m1, -m2:, :m3].set(mul(x_ft[:, :, :m1, -m2:, :m3], w3))
    out_ft = out_ft.at[:, :, -m1:, -m2:, :m3].set(mul(x_ft[:, :, -m1:, -m2:, :m3], w4))
    return jnp.fft.irfftn(out_ft, s=(D1, D2, D3), axes=(-3, -2, -1)).astype(jnp.float32)


if __name__ == "__main__":
    # Small, PyTorch-consistent shapes.
    B, Ci, Co = 2, 4, 4
    D1 = D2 = D3 = 16
    m1 = m2 = m3 = 4

    key = jax.random.PRNGKey(0)
    kx, k1r, k1i, k2r, k2i, k3r, k3i, k4r, k4i = jax.random.split(key, 9)

    x = jax.random.normal(kx, (B, Ci, D1, D2, D3), dtype=jnp.float32)

    # scale * rand(cfloat): uniform [0, scale) for real and imag parts, deterministic.
    scale = 1.0 / (Ci * Co)
    wshape = (Ci, Co, m1, m2, m3)

    def make_w(kr, ki):
        wre = scale * jax.random.uniform(kr, wshape, dtype=jnp.float32)
        wim = scale * jax.random.uniform(ki, wshape, dtype=jnp.float32)
        return (wre + 1j * wim).astype(jnp.complex64)

    w1 = make_w(k1r, k1i)
    w2 = make_w(k2r, k2i)
    w3 = make_w(k3r, k3i)
    w4 = make_w(k4r, k4i)

    y = spectral_conv3d(x, w1, w2, w3, w4, modes1=m1, modes2=m2, modes3=m3)
    y = jax.block_until_ready(y)

    y_ref = _reference(x, w1, w2, w3, w4, m1, m2, m3)
    assert y.shape == (B, Co, D1, D2, D3)
    assert jnp.allclose(y, y_ref, atol=1e-4, rtol=1e-4), "mismatch vs reference"

    print("KERNEL_OK")
</pallas_src>

<mosaic_0001>
module attributes {stable_mosaic.version = 11 : i64} {
  func.func @_spectral_mac_kernel(%arg0: i32, %arg1: i32, %arg2: memref<8x128xf32, #tpu.memory_space<vmem>>, %arg3: memref<8x128xf32, #tpu.memory_space<vmem>>, %arg4: memref<4x8x128xf32, #tpu.memory_space<vmem>>, %arg5: memref<4x8x128xf32, #tpu.memory_space<vmem>>, %arg6: memref<2x8x128xf32, #tpu.memory_space<vmem>>, %arg7: memref<2x8x128xf32, #tpu.memory_space<vmem>>) attributes {dimension_semantics = [#tpu.dimension_semantics<parallel>, #tpu.dimension_semantics<parallel>], iteration_bounds = array<i64: 2, 1>, scalar_prefetch = 0 : i64, scratch_operands = 0 : i64, tpu.core_type = #tpu.core_type<tc>, window_params = [{transform_indices = @transform_0, window_bounds = array<i64: 8, 128>}, {transform_indices = @transform_1, window_bounds = array<i64: 8, 128>}, {transform_indices = @transform_2, window_bounds = array<i64: 4, 8, 128>}, {transform_indices = @transform_3, window_bounds = array<i64: 4, 8, 128>}, {transform_indices = @transform_4, window_bounds = array<i64: 2, 8, 128>}, {transform_indices = @transform_5, window_bounds = array<i64: 2, 8, 128>}]} {
    %cst = arith.constant 0.000000e+00 : f32
    %0 = vector.broadcast %cst : f32 to vector<8x128xf32>
    %cst_0 = arith.constant 0.000000e+00 : f32
    %1 = vector.broadcast %cst_0 : f32 to vector<8x128xf32>
    %c0 = arith.constant 0 : index
    %c0_1 = arith.constant 0 : index
    %2 = vector.load %arg2[%c0, %c0_1] : memref<8x128xf32, #tpu.memory_space<vmem>>, vector<1x128xf32>
    %c0_2 = arith.constant 0 : index
    %c0_3 = arith.constant 0 : index
    %3 = vector.load %arg3[%c0_2, %c0_3] : memref<8x128xf32, #tpu.memory_space<vmem>>, vector<1x128xf32>
    %c0_4 = arith.constant 0 : index
    %c0_5 = arith.constant 0 : index
    %c0_6 = arith.constant 0 : index
    %4 = vector.load %arg4[%c0_4, %c0_5, %c0_6] : memref<4x8x128xf32, #tpu.memory_space<vmem>>, vector<1x8x128xf32>
    %5 = vector.shape_cast %4 : vector<1x8x128xf32> to vector<8x128xf32>
    %c0_7 = arith.constant 0 : index
    %c0_8 = arith.constant 0 : index
    %c0_9 = arith.constant 0 : index
    %6 = vector.load %arg5[%c0_7, %c0_8, %c0_9] : memref<4x8x128xf32, #tpu.memory_space<vmem>>, vector<1x8x128xf32>
    %7 = vector.shape_cast %6 : vector<1x8x128xf32> to vector<8x128xf32>
    %8 = vector.broadcast %2 : vector<1x128xf32> to vector<8x128xf32>
    %9 = arith.mulf %8, %5 : vector<8x128xf32>
    %10 = vector.broadcast %3 : vector<1x128xf32> to vector<8x128xf32>
    %11 = arith.mulf %10, %7 : vector<8x128xf32>
    %12 = arith.subf %9, %11 : vector<8x128xf32>
    %13 = arith.addf %0, %12 : vector<8x128xf32>
    %14 = vector.broadcast %2 : vector<1x128xf32> to vector<8x128xf32>
    %15 = arith.mulf %14, %7 : vector<8x128xf32>
    %16 = vector.broadcast %3 : vector<1x128xf32> to vector<8x128xf32>
    %17 = arith.mulf %16, %5 : vector<8x128xf32>
    %18 = arith.addf %15, %17 : vector<8x128xf32>
    %19 = arith.addf %1, %18 : vector<8x128xf32>
    %c1 = arith.constant 1 : index
    %c0_10 = arith.constant 0 : index
    %20 = vector.load %arg2[%c1, %c0_10] : memref<8x128xf32, #tpu.memory_space<vmem>>, vector<1x128xf32>
    %c1_11 = arith.constant 1 : index
    %c0_12 = arith.constant 0 : index
    %21 = vector.load %arg3[%c1_11, %c0_12] : memref<8x128xf32, #tpu.memory_space<vmem>>, vector<1x128xf32>
    %c1_13 = arith.constant 1 : index
    %c0_14 = arith.constant 0 : index
    %c0_15 = arith.constant 0 : index
    %22 = vector.load %arg4[%c1_13, %c0_14, %c0_15] : memref<4x8x128xf32, #tpu.memory_space<vmem>>, vector<1x8x128xf32>
    %23 = vector.shape_cast %22 : vector<1x8x128xf32> to vector<8x128xf32>
    %c1_16 = arith.constant 1 : index
    %c0_17 = arith.constant 0 : index
    %c0_18 = arith.constant 0 : index
    %24 = vector.load %arg5[%c1_16, %c0_17, %c0_18] : memref<4x8x128xf32, #tpu.memory_space<vmem>>, vector<1x8x128xf32>
    %25 = vector.shape_cast %24 : vector<1x8x128xf32> to vector<8x128xf32>
    %26 = vector.broadcast %20 : vector<1x128xf32> to vector<8x128xf32>
    %27 = arith.mulf %26, %23 : vector<8x128xf32>
    %28 = vector.broadcast %21 : vector<1x128xf32> to vector<8x128xf32>
    %29 = arith.mulf %28, %25 : vector<8x128xf32>
    %30 = arith.subf %27, %29 : vector<8x128xf32>
    %31 = arith.addf %13, %30 : vector<8x128xf32>
    %32 = vector.broadcast %20 : vector<1x128xf32> to vector<8x128xf32>
    %33 = arith.mulf %32, %25 : vector<8x128xf32>
    %34 = vector.broadcast %21 : vector<1x128xf32> to vector<8x128xf32>
    %35 = arith.mulf %34, %23 : vector<8x128xf32>
    %36 = arith.addf %33, %35 : vector<8x128xf32>
    %37 = arith.addf %19, %36 : vector<8x128xf32>
    %c2 = arith.constant 2 : index
    %c0_19 = arith.constant 0 : index
    %38 = vector.load %arg2[%c2, %c0_19] : memref<8x128xf32, #tpu.memory_space<vmem>>, vector<1x128xf32>
    %c2_20 = arith.constant 2 : index
    %c0_21 = arith.constant 0 : index
    %39 = vector.load %arg3[%c2_20, %c0_21] : memref<8x128xf32, #tpu.memory_space<vmem>>, vector<1x128xf32>
    %c2_22 = arith.constant 2 : index
    %c0_23 = arith.constant 0 : index
    %c0_24 = arith.constant 0 : index
    %40 = vector.load %arg4[%c2_22, %c0_23, %c0_24] : memref<4x8x128xf32, #tpu.memory_space<vmem>>, vector<1x8x128xf32>
    %41 = vector.shape_cast %40 : vector<1x8x128xf32> to vector<8x128xf32>
    %c2_25 = arith.constant 2 : index
    %c0_26 = arith.constant 0 : index
    %c0_27 = arith.constant 0 : index
    %42 = vector.load %arg5[%c2_25, %c0_26, %c0_27] : memref<4x8x128xf32, #tpu.memory_space<vmem>>, vector<1x8x128xf32>
    %43 = vector.shape_cast %42 : vector<1x8x128xf32> to vector<8x128xf32>
    %44 = vector.broadcast %38 : vector<1x128xf32> to vector<8x128xf32>
    %45 = arith.mulf %44, %41 : vector<8x128xf32>
    %46 = vector.broadcast %39 : vector<1x128xf32> to vector<8x128xf32>
    %47 = arith.mulf %46, %43 : vector<8x128xf32>
    %48 = arith.subf %45, %47 : vector<8x128xf32>
    %49 = arith.addf %31, %48 : vector<8x128xf32>
    %50 = vector.broadcast %38 : vector<1x128xf32> to vector<8x128xf32>
    %51 = arith.mulf %50, %43 : vector<8x128xf32>
    %52 = vector.broadcast %39 : vector<1x128xf32> to vector<8x128xf32>
    %53 = arith.mulf %52, %41 : vector<8x128xf32>
    %54 = arith.addf %51, %53 : vector<8x128xf32>
    %55 = arith.addf %37, %54 : vector<8x128xf32>
    %c3 = arith.constant 3 : index
    %c0_28 = arith.constant 0 : index
    %56 = vector.load %arg2[%c3, %c0_28] : memref<8x128xf32, #tpu.memory_space<vmem>>, vector<1x128xf32>
    %c3_29 = arith.constant 3 : index
    %c0_30 = arith.constant 0 : index
    %57 = vector.load %arg3[%c3_29, %c0_30] : memref<8x128xf32, #tpu.memory_space<vmem>>, vector<1x128xf32>
    %c3_31 = arith.constant 3 : index
    %c0_32 = arith.constant 0 : index
    %c0_33 = arith.constant 0 : index
    %58 = vector.load %arg4[%c3_31, %c0_32, %c0_33] : memref<4x8x128xf32, #tpu.memory_space<vmem>>, vector<1x8x128xf32>
    %59 = vector.shape_cast %58 : vector<1x8x128xf32> to vector<8x128xf32>
    %c3_34 = arith.constant 3 : index
    %c0_35 = arith.constant 0 : index
    %c0_36 = arith.constant 0 : index
    %60 = vector.load %arg5[%c3_34, %c0_35, %c0_36] : memref<4x8x128xf32, #tpu.memory_space<vmem>>, vector<1x8x128xf32>
    %61 = vector.shape_cast %60 : vector<1x8x128xf32> to vector<8x128xf32>
    %62 = vector.broadcast %56 : vector<1x128xf32> to vector<8x128xf32>
    %63 = arith.mulf %62, %59 : vector<8x128xf32>
    %64 = vector.broadcast %57 : vector<1x128xf32> to vector<8x128xf32>
    %65 = arith.mulf %64, %61 : vector<8x128xf32>
    %66 = arith.subf %63, %65 : vector<8x128xf32>
    %67 = arith.addf %49, %66 : vector<8x128xf32>
    %68 = vector.broadcast %56 : vector<1x128xf32> to vector<8x128xf32>
    %69 = arith.mulf %68, %61 : vector<8x128xf32>
    %70 = vector.broadcast %57 : vector<1x128xf32> to vector<8x128xf32>
    %71 = arith.mulf %70, %59 : vector<8x128xf32>
    %72 = arith.addf %69, %71 : vector<8x128xf32>
    %73 = arith.addf %55, %72 : vector<8x128xf32>
    %c0_37 = arith.constant 0 : index
    %c0_38 = arith.constant 0 : index
    %c0_39 = arith.constant 0 : index
    %74 = vector.load %arg6[%c0_37, %c0_38, %c0_39] : memref<2x8x128xf32, #tpu.memory_space<vmem>>, vector<1x8x128xf32>
    %75 = vector.shape_cast %74 : vector<1x8x128xf32> to vector<8x128xf32>
    %76 = vector.shape_cast %67 : vector<8x128xf32> to vector<1x8x128xf32>
    tpu.vector_store %arg6[%c0_37, %c0_38, %c0_39], %76 {strides = array<i32>} : memref<2x8x128xf32, #tpu.memory_space<vmem>>, vector<1x8x128xf32>,
    %c0_40 = arith.constant 0 : index
    %c0_41 = arith.constant 0 : index
    %c0_42 = arith.constant 0 : index
    %77 = vector.load %arg7[%c0_40, %c0_41, %c0_42] : memref<2x8x128xf32, #tpu.memory_space<vmem>>, vector<1x8x128xf32>
    %78 = vector.shape_cast %77 : vector<1x8x128xf32> to vector<8x128xf32>
    %79 = vector.shape_cast %73 : vector<8x128xf32> to vector<1x8x128xf32>
    tpu.vector_store %arg7[%c0_40, %c0_41, %c0_42], %79 {strides = array<i32>} : memref<2x8x128xf32, #tpu.memory_space<vmem>>, vector<1x8x128xf32>,
    %cst_43 = arith.constant 0.000000e+00 : f32
    %80 = vector.broadcast %cst_43 : f32 to vector<8x128xf32>
    %cst_44 = arith.constant 0.000000e+00 : f32
    %81 = vector.broadcast %cst_44 : f32 to vector<8x128xf32>
    %c4 = arith.constant 4 : index
    %c0_45 = arith.constant 0 : index
    %82 = vector.load %arg2[%c4, %c0_45] : memref<8x128xf32, #tpu.memory_space<vmem>>, vector<1x128xf32>
    %c4_46 = arith.constant 4 : index
    %c0_47 = arith.constant 0 : index
    %83 = vector.load %arg3[%c4_46, %c0_47] : memref<8x128xf32, #tpu.memory_space<vmem>>, vector<1x128xf32>
    %c0_48 = arith.constant 0 : index
    %c0_49 = arith.constant 0 : index
    %c0_50 = arith.constant 0 : index
    %84 = vector.load %arg4[%c0_48, %c0_49, %c0_50] : memref<4x8x128xf32, #tpu.memory_space<vmem>>, vector<1x8x128xf32>
    %85 = vector.shape_cast %84 : vector<1x8x128xf32> to vector<8x128xf32>
    %c0_51 = arith.constant 0 : index
    %c0_52 = arith.constant 0 : index
    %c0_53 = arith.constant 0 : index
    %86 = vector.load %arg5[%c0_51, %c0_52, %c0_53] : memref<4x8x128xf32, #tpu.memory_space<vmem>>, vector<1x8x128xf32>
    %87 = vector.shape_cast %86 : vector<1x8x128xf32> to vector<8x128xf32>
    %88 = vector.broadcast %82 : vector<1x128xf32> to vector<8x128xf32>
    %89 = arith.mulf %88, %85 : vector<8x128xf32>
    %90 = vector.broadcast %83 : vector<1x128xf32> to vector<8x128xf32>
    %91 = arith.mulf %90, %87 : vector<8x128xf32>
    %92 = arith.subf %89, %91 : vector<8x128xf32>
    %93 = arith.addf %80, %92 : vector<8x128xf32>
    %94 = vector.broadcast %82 : vector<1x128xf32> to vector<8x128xf32>
    %95 = arith.mulf %94, %87 : vector<8x128xf32>
    %96 = vector.broadcast %83 : vector<1x128xf32> to vector<8x128xf32>
    %97 = arith.mulf %96, %85 : vector<8x128xf32>
    %98 = arith.addf %95, %97 : vector<8x128xf32>
    %99 = arith.addf %81, %98 : vector<8x128xf32>
    %c5 = arith.constant 5 : index
    %c0_54 = arith.constant 0 : index
    %100 = vector.load %arg2[%c5, %c0_54] : memref<8x128xf32, #tpu.memory_space<vmem>>, vector<1x128xf32>
    %c5_55 = arith.constant 5 : index
    %c0_56 = arith.constant 0 : index
    %101 = vector.load %arg3[%c5_55, %c0_56] : memref<8x128xf32, #tpu.memory_space<vmem>>, vector<1x128xf32>
    %c1_57 = arith.constant 1 : index
    %c0_58 = arith.constant 0 : index
    %c0_59 = arith.constant 0 : index
    %102 = vector.load %arg4[%c1_57, %c0_58, %c0_59] : memref<4x8x128xf32, #tpu.memory_space<vmem>>, vector<1x8x128xf32>
    %103 = vector.shape_cast %102 : vector<1x8x128xf32> to vector<8x128xf32>
    %c1_60 = arith.constant 1 : index
    %c0_61 = arith.constant 0 : index
    %c0_62 = arith.constant 0 : index
    %104 = vector.load %arg5[%c1_60, %c0_61, %c0_62] : memref<4x8x128xf32, #tpu.memory_space<vmem>>, vector<1x8x128xf32>
    %105 = vector.shape_cast %104 : vector<1x8x128xf32> to vector<8x128xf32>
    %106 = vector.broadcast %100 : vector<1x128xf32> to vector<8x128xf32>
    %107 = arith.mulf %106, %103 : vector<8x128xf32>
    %108 = vector.broadcast %101 : vector<1x128xf32> to vector<8x128xf32>
    %109 = arith.mulf %108, %105 : vector<8x128xf32>
    %110 = arith.subf %107, %109 : vector<8x128xf32>
    %111 = arith.addf %93, %110 : vector<8x128xf32>
    %112 = vector.broadcast %100 : vector<1x128xf32> to vector<8x128xf32>
    %113 = arith.mulf %112, %105 : vector<8x128xf32>
    %114 = vector.broadcast %101 : vector<1x128xf32> to vector<8x128xf32>
    %115 = arith.mulf %114, %103 : vector<8x128xf32>
    %116 = arith.addf %113, %115 : vector<8x128xf32>
    %117 = arith.addf %99, %116 : vector<8x128xf32>
    %c6 = arith.constant 6 : index
    %c0_63 = arith.constant 0 : index
    %118 = vector.load %arg2[%c6, %c0_63] : memref<8x128xf32, #tpu.memory_space<vmem>>, vector<1x128xf32>
    %c6_64 = arith.constant 6 : index
    %c0_65 = arith.constant 0 : index
    %119 = vector.load %arg3[%c6_64, %c0_65] : memref<8x128xf32, #tpu.memory_space<vmem>>, vector<1x128xf32>
    %c2_66 = arith.constant 2 : index
    %c0_67 = arith.constant 0 : index
    %c0_68 = arith.constant 0 : index
    %120 = vector.load %arg4[%c2_66, %c0_67, %c0_68] : memref<4x8x128xf32, #tpu.memory_space<vmem>>, vector<1x8x128xf32>
    %121 = vector.shape_cast %120 : vector<1x8x128xf32> to vector<8x128xf32>
    %c2_69 = arith.constant 2 : index
    %c0_70 = arith.constant 0 : index
    %c0_71 = arith.constant 0 : index
    %122 = vector.load %arg5[%c2_69, %c0_70, %c0_71] : memref<4x8x128xf32, #tpu.memory_space<vmem>>, vector<1x8x128xf32>
    %123 = vector.shape_cast %122 : vector<1x8x128xf32> to vector<8x128xf32>
    %124 = vector.broadcast %118 : vector<1x128xf32> to vector<8x128xf32>
    %125 = arith.mulf %124, %121 : vector<8x128xf32>
    %126 = vector.broadcast %119 : vector<1x128xf32> to vector<8x128xf32>
    %127 = arith.mulf %126, %123 : vector<8x128xf32>
    %128 = arith.subf %125, %127 : vector<8x128xf32>
    %129 = arith.addf %111, %128 : vector<8x128xf32>
    %130 = vector.broadcast %118 : vector<1x128xf32> to vector<8x128xf32>
    %131 = arith.mulf %130, %123 : vector<8x128xf32>
    %132 = vector.broadcast %119 : vector<1x128xf32> to vector<8x128xf32>
    %133 = arith.mulf %132, %121 : vector<8x128xf32>
    %134 = arith.addf %131, %133 : vector<8x128xf32>
    %135 = arith.addf %117, %134 : vector<8x128xf32>
    %c7 = arith.constant 7 : index
    %c0_72 = arith.constant 0 : index
    %136 = vector.load %arg2[%c7, %c0_72] : memref<8x128xf32, #tpu.memory_space<vmem>>, vector<1x128xf32>
    %c7_73 = arith.constant 7 : index
    %c0_74 = arith.constant 0 : index
    %137 = vector.load %arg3[%c7_73, %c0_74] : memref<8x128xf32, #tpu.memory_space<vmem>>, vector<1x128xf32>
    %c3_75 = arith.constant 3 : index
    %c0_76 = arith.constant 0 : index
    %c0_77 = arith.constant 0 : index
    %138 = vector.load %arg4[%c3_75, %c0_76, %c0_77] : memref<4x8x128xf32, #tpu.memory_space<vmem>>, vector<1x8x128xf32>
    %139 = vector.shape_cast %138 : vector<1x8x128xf32> to vector<8x128xf32>
    %c3_78 = arith.constant 3 : index
    %c0_79 = arith.constant 0 : index
    %c0_80 = arith.constant 0 : index
    %140 = vector.load %arg5[%c3_78, %c0_79, %c0_80] : memref<4x8x128xf32, #tpu.memory_space<vmem>>, vector<1x8x128xf32>
    %141 = vector.shape_cast %140 : vector<1x8x128xf32> to vector<8x128xf32>
    %142 = vector.broadcast %136 : vector<1x128xf32> to vector<8x128xf32>
    %143 = arith.mulf %142, %139 : vector<8x128xf32>
    %144 = vector.broadcast %137 : vector<1x128xf32> to vector<8x128xf32>
    %145 = arith.mulf %144, %141 : vector<8x128xf32>
    %146 = arith.subf %143, %145 : vector<8x128xf32>
    %147 = arith.addf %129, %146 : vector<8x128xf32>
    %148 = vector.broadcast %136 : vector<1x128xf32> to vector<8x128xf32>
    %149 = arith.mulf %148, %141 : vector<8x128xf32>
    %150 = vector.broadcast %137 : vector<1x128xf32> to vector<8x128xf32>
    %151 = arith.mulf %150, %139 : vector<8x128xf32>
    %152 = arith.addf %149, %151 : vector<8x128xf32>
    %153 = arith.addf %135, %152 : vector<8x128xf32>
    %c1_81 = arith.constant 1 : index
    %c0_82 = arith.constant 0 : index
    %c0_83 = arith.constant 0 : index
    %154 = vector.load %arg6[%c1_81, %c0_82, %c0_83] : memref<2x8x128xf32, #tpu.memory_space<vmem>>, vector<1x8x128xf32>
    %155 = vector.shape_cast %154 : vector<1x8x128xf32> to vector<8x128xf32>
    %156 = vector.shape_cast %147 : vector<8x128xf32> to vector<1x8x128xf32>
    tpu.vector_store %arg6[%c1_81, %c0_82, %c0_83], %156 {strides = array<i32>} : memref<2x8x128xf32, #tpu.memory_space<vmem>>, vector<1x8x128xf32>,
    %c1_84 = arith.constant 1 : index
    %c0_85 = arith.constant 0 : index
    %c0_86 = arith.constant 0 : index
    %157 = vector.load %arg7[%c1_84, %c0_85, %c0_86] : memref<2x8x128xf32, #tpu.memory_space<vmem>>, vector<1x8x128xf32>
    %158 = vector.shape_cast %157 : vector<1x8x128xf32> to vector<8x128xf32>
    %159 = vector.shape_cast %153 : vector<8x128xf32> to vector<1x8x128xf32>
    tpu.vector_store %arg7[%c1_84, %c0_85, %c0_86], %159 {strides = array<i32>} : memref<2x8x128xf32, #tpu.memory_space<vmem>>, vector<1x8x128xf32>,
    return
  }
  func.func @transform_0(%arg0: i32, %arg1: i32) -> (i32, i32) {
    %c0_i32 = arith.constant 0 : i32
    %c0_i32_0 = arith.constant 0 : i32
    return %c0_i32, %arg0 : i32, i32
  }
  func.func @transform_1(%arg0: i32, %arg1: i32) -> (i32, i32) {
    %c0_i32 = arith.constant 0 : i32
    %c0_i32_0 = arith.constant 0 : i32
    return %c0_i32, %arg0 : i32, i32
  }
  func.func @transform_2(%arg0: i32, %arg1: i32) -> (i32, i32, i32) {
    %c0_i32 = arith.constant 0 : i32
    %c0_i32_0 = arith.constant 0 : i32
    return %c0_i32, %arg1, %arg0 : i32, i32, i32
  }
  func.func @transform_3(%arg0: i32, %arg1: i32) -> (i32, i32, i32) {
    %c0_i32 = arith.constant 0 : i32
    %c0_i32_0 = arith.constant 0 : i32
    return %c0_i32, %arg1, %arg0 : i32, i32, i32
  }
  func.func @transform_4(%arg0: i32, %arg1: i32) -> (i32, i32, i32) {
    %c0_i32 = arith.constant 0 : i32
    %c0_i32_0 = arith.constant 0 : i32
    return %c0_i32, %arg1, %arg0 : i32, i32, i32
  }
  func.func @transform_5(%arg0: i32, %arg1: i32) -> (i32, i32, i32) {
    %c0_i32 = arith.constant 0 : i32
    %c0_i32_0 = arith.constant 0 : i32
    return %c0_i32, %arg1, %arg0 : i32, i32, i32
  }
}

</mosaic_0001>

<bundles_post_ra>
// kernel: custom-call
= control target key start
LH: loop header
LB: loop body
LE: loop exit
PB: predicated region body
PF: predicated region fallthrough
CT: control target
= control target key end

     0   :  { %2 = vsyncpa [#allocation0], 0  ;;  %s55_s0 = inlined_call_operand.hbm [shape: c64[4,4,4,4,4], index: 0, kind: input, shape index: {}]   ;;  %s56_s1 = inlined_call_operand.vmem [shape: f32[4,4,4,4,4], index: 1, kind: output, shape index: {}]  }
   0x1   :  { %s4_s8 = sshll.u32 %s55_s0, 4  ;;  %s6_s11 = sshll.u32 %s56_s1, 4  ;;  %s5_s8 = int_to_ptr.hbm [resolvable:$true] %s4_s8  ;;  %s7_s11 = int_to_ptr.vmem [resolvable:$true] %s6_s11 }
   0x2   :  { %9 = dma.hbm_to_vmem [thread:$0]  %s5_s8, 4096, %s7_s11, [#allocation0] }
   0x3   :  { %37 = dma.done.wait [#allocation0], 4096  }
   0x4   :  { %38 = vsyncadd [#allocation0], 4294963200 }
   0x5   :  { %12 = vsyncpa [#allocation0], 1 }

// kernel: custom-call.1
= control target key start
LH: loop header
LB: loop body
LE: loop exit
PB: predicated region body
PF: predicated region fallthrough
CT: control target
= control target key end

     0   :  { %s56_s0 = inlined_call_operand.hbm [shape: c64[4,4,4,4,4], index: 0, kind: input, shape index: {}]   ;;  %s57_s1 = inlined_call_operand.vmem [shape: f32[4,4,4,4,4], index: 1, kind: output, shape index: {}]  }
   0x1   :  { %s2_s8 = scalar_lea.hbm %s56_s0, 256 }
   0x2   :  { %3 = vsyncpa [#allocation0], 0  ;;  %s5_s9 = sshll.u32 %s2_s8, 4  ;;  %s7_s12 = sshll.u32 %s57_s1, 4  ;;  %s6_s9 = int_to_ptr.hbm [resolvable:$true] %s5_s9  ;;  %s8_s12 = int_to_ptr.vmem [resolvable:$true] %s7_s12 }
   0x3   :  { %10 = dma.hbm_to_vmem [thread:$0]  %s6_s9, 4096, %s8_s12, [#allocation0] }
   0x4   :  { %38 = dma.done.wait [#allocation0], 4096  }
   0x5   :  { %39 = vsyncadd [#allocation0], 4294963200 }
   0x6   :  { %13 = vsyncpa [#allocation0], 1 }

// kernel: spectral_conv3d.1
= control target key start
LH: loop header
LB: loop body
LE: loop exit
PB: predicated region body
PF: predicated region fallthrough
CT: control target
= control target key end

     0   :  { %s922_s18 = smov 0   ;;  %s924_s19 = smov 0   ;;  %s1087_s0 = inlined_call_operand.vmem [shape: f32[8,256], index: 0, kind: input, shape index: {}]   ;;  %s1088_s1 = inlined_call_operand.vmem [shape: f32[8,256], index: 1, kind: input, shape index: {}]   ;;  %s1089_s2 = inlined_call_operand.vmem [shape: f32[4,8,256], index: 2, kind: input, shape index: {}]   ;;  %s1090_s3 = inlined_call_operand.vmem [shape: f32[4,8,256], index: 3, kind: input, shape index: {}]   ;;  %s1091_s4 = inlined_call_operand.vmem [shape: f32[2,8,256], index: 4, kind: output, shape index: {0}]   ;;  %s1092_s5 = inlined_call_operand.vmem [shape: f32[2,8,256], index: 5, kind: output, shape index: {1}]  }
   0x1   :  { %s926_s20 = smov 0   ;;  %s928_s21 = smov 0  }
   0x2   :  { %s930_s22 = smov 0  }
   0x3 LB: > { %s28_s23 = sadd.s32 1, %s886_s21  ;;  %s761_s24 = sadd.s32 4294967295, %s890_s22   ;;  %s890_s22 = sphi %s930_s22, %s16_s22   ;;  %s886_s21 = sphi %s928_s21, %s1098_s21   ;;  %s882_s20 = sphi %s926_s20, %s1097_s20   ;;  %s878_s19 = sphi %s924_s19, %s1096_s19   ;;  %s874_s18 = sphi %s922_s18, %s1095_s18  }
   0x4   : > { %p30_p0 = scmp.ge.s32.totalorder %s28_s23, 2  ;;  %p96_p1 = scmp.ne.s32.totalorder %s878_s19, %s874_s18 }
   0x5   : > { %p97_p2 = scmp.eq.s32.totalorder %s890_s22, 0  ;;  %p156_p4 = scmp.eq.s32.totalorder %s761_s24, 1 }
   0x6   : > { %s1100_s23 = smov (%p30_p0, %s28_s23), 0  ;;  %s89_s27 = sadd.s32 1, %s878_s19 }
   0x7   : > { %p954_p3 = por %p97_p2, %p96_p1  ;;  %s85_s26 = ssub.s32 %s886_s21, %s1100_s23 }
   0x8   : > { %p87_p5 = scmp.eq.s32.totalorder %s85_s26, 0  ;;  %p961_p6 = por %p156_p4, %p96_p1 }
   0x9   : > { %p764_p7 = scmp.ge.s32.totalorder %s890_s22, 2 }
   0xa   : > { %s966_s29 = scalar_select %p87_p5, %s878_s19, %s89_s27  }
   0xb   : > { %206 = sbr.rel (%p764_p7) target bundleno = 32 (0x20), region = 16 }
  0x10   : > { %223 = sbr.rel (!%p954_p3) target bundleno = 24 (0x18), region = 28  ;;  %s225_s30 = sand.u32 (%p954_p3), 1, %s878_s19  }
  0x11   : > { %s766_s6 = sshll.u32 (%p954_p3), %s886_s21, 3  ;;  %s765_s7 = sshll.u32 (%p954_p3), %s225_s30, 5 }
  0x12   : > { %s231_s10 = scalar_lea.vmem (%p954_p3), %s1089_s2, %s766_s6  ;;  %s227_s11 = scalar_lea.vmem (%p954_p3), [#allocation2], %s765_s7 }
  0x13   : > { %v266_v0 = vld [vmem:[%s231_s10] sm:$0xff] (%p954_p3)  ;;  %v268_v1 = vld [vmem:[%s231_s10 + $0x10] sm:$0xff] (%p954_p3) }
  0x14   : > { %v270_v2 = vld [vmem:[%s231_s10 + $0x20] sm:$0xff] (%p954_p3)  ;;  %267 = vst [vmem:[%s227_s11] sm:$0xff] (%p954_p3), %v266_v0  ;;  %v272_v3 = vld [vmem:[%s231_s10 + $0x30] sm:$0xff] (%p954_p3) }
  0x15   : > { %269 = vst [vmem:[%s227_s11 + $0x8] sm:$0xff] %v268_v1 }
  0x16   : > { %271 = vst [vmem:[%s227_s11 + $0x10] sm:$0xff] %v270_v2 }
  0x17   : > { %273 = vst [vmem:[%s227_s11 + $0x18] sm:$0xff] %v272_v3 }
  0x18 PF: > { %279 = sbr.rel (!%p954_p3) target bundleno = 32 (0x20), region = 66  ;;  %s281_s12 = sand.u32 (%p954_p3), 1, %s878_s19  }
  0x19   : > { %s768_s13 = sshll.u32 (%p954_p3), %s886_s21, 3  ;;  %s767_s14 = sshll.u32 (%p954_p3), %s281_s12, 5 }
  0x1a   : > { %s287_s17 = scalar_lea.vmem (%p954_p3), %s1090_s3, %s768_s13  ;;  %s283_s24 = scalar_lea.vmem (%p954_p3), [#allocation3], %s767_s14 }
  0x1b   : > { %v322_v4 = vld [vmem:[%s287_s17] sm:$0xff] (%p954_p3)  ;;  %v324_v5 = vld [vmem:[%s287_s17 + $0x10] sm:$0xff] (%p954_p3) }
  0x1c   : > { %v326_v6 = vld [vmem:[%s287_s17 + $0x20] sm:$0xff] (%p954_p3)  ;;  %323 = vst [vmem:[%s283_s24] sm:$0xff] (%p954_p3), %v322_v4  ;;  %v328_v7 = vld [vmem:[%s287_s17 + $0x30] sm:$0xff] (%p954_p3) }
  0x1d   : > { %325 = vst [vmem:[%s283_s24 + $0x8] sm:$0xff] %v324_v5 }
  0x1e   : > { %327 = vst [vmem:[%s283_s24 + $0x10] sm:$0xff] %v326_v6 }
  0x1f   : > { %329 = vst [vmem:[%s283_s24 + $0x18] sm:$0xff] %v328_v7 }
  0x20 PF: > { %p769_p8 = scmp.ge.s32.totalorder %s890_s22, 1  ;;  %p334_p9 = scmp.lt.s32.totalorder %s890_s22, 3 }
  0x22   : > { %p335_p10 = pnand %p769_p8, %p334_p9 }
  0x23   : > { %s341_s25 = sand.u32 (!%p335_p10), 1, %s874_s18   ;;  %p390_p11 = scmp.lt.s32.totalorder (!%p335_p10), %s882_s20, 1 }
  0x24   : > { %338 = sbr.rel (%p335_p10) target bundleno = 80 (0x50), region = 104  ;;  %s770_s26 = sshll.u32 (!%p335_p10), %s341_s25, 5 }
  0x25   : > { %s988_s30 = sshll.u32 (!%p335_p10), %s341_s25, 4  ;;  %s343_s7 = scalar_lea.vmem (!%p335_p10), [#allocation2], %s770_s26 }
  0x26   : > { %s350_s13 = scalar_lea.vmem (!%p335_p10), [#allocation3], %s770_s26  ;;  %s383_s14 = scalar_lea.vmem (!%p335_p10), [#allocation4], %s988_s30 }
  0x27   : > { %s389_s15 = scalar_lea.vmem (!%p335_p10), [#allocation5], %s988_s30 }
  0x29   : > { %s391_s27 = scalar_select %p390_p11, %s882_s20, 1  ;;  %v990_v8 = vld [vmem:[%s343_s7] sm:$0xff]  ;;  %v1002_v10 = vld [vmem:[%s343_s7 + $0x8] sm:$0xff]  ;;  %v1007_v13 = vld [vmem:[%s343_s7 + $0x10] sm:$0xff] }
  0x2a   : > { %v401_v9 = vld [vmem:[%s350_s13] sm:$0xff]  ;;  %v1004_v11 = vld [vmem:[%s350_s13 + $0x8] sm:$0xff]  ;;  %v1009_v14 = vld [vmem:[%s350_s13 + $0x10] sm:$0xff]  ;;  %s792_s16 = sshll.u32 (%p961_p6), %s882_s20, 3 }
  0x2b   : > { %s774_s6 = sshll.u32 %s391_s27, 3  ;;  %v1012_v16 = vld [vmem:[%s343_s7 + $0x18] sm:$0xff]  ;;  %s536_s25 = scalar_lea.vmem (%p961_p6), %s1091_s4, %s792_s16 }
  0x2c   : > { %s995_s10 = scalar_lea.vmem %s1087_s0, %s774_s6  ;;  %s1000_s18 = scalar_lea.vmem %s1088_s1, %s774_s6  ;;  %v1017_v20 = vld [vmem:[%s350_s13 + $0x18] sm:$0xff] }
  0x2d   : > { %v836_v12 = vld [vmem:[%s995_s10] ss:$0 sm:$0xff]  ;;  %v838_v18 = vld [vmem:[%s995_s10 + $0x1] ss:$0 sm:$0xff]  ;;  %v840_v23 = vld [vmem:[%s995_s10 + $0x2] ss:$0 sm:$0xff] }
  0x2e   : > { %v837_v15 = vld [vmem:[%s1000_s18] ss:$0 sm:$0xff]  ;;  %v403_v17 = vmul.f32 %v836_v12, %v990_v8  ;;  %v839_v19 = vld [vmem:[%s1000_s18 + $0x1] ss:$0 sm:$0xff]  ;;  %v408_v21 = vmul.f32 %v836_v12, %v401_v9  ;;  %v841_v24 = vld [vmem:[%s1000_s18 + $0x2] ss:$0 sm:$0xff]  ;;  %v419_v26 = vmul.f32 %v838_v18, %v1002_v10  ;;  %v424_v29 = vmul.f32 %v838_v18, %v1004_v11 }
  0x2f   : > { %v405_v22 = vmul.f32 %v837_v15, %v401_v9  ;;  %v409_v25 = vmul.f32 %v837_v15, %v990_v8  ;;  %v421_v27 = vmul.f32 %v839_v19, %v1004_v11  ;;  %v842_v28 = vld [vmem:[%s995_s10 + $0x3] ss:$0 sm:$0xff]  ;;  %v425_v30 = vmul.f32 %v839_v19, %v1002_v10  ;;  %v844_v40 = vld [vmem:[%s995_s10 + $0x4] ss:$0 sm:$0xff]  ;;  %v846_v46 = vld [vmem:[%s995_s10 + $0x5] ss:$0 sm:$0xff] }
  0x30   : > { %v435_v32 = vmul.f32 %v840_v23, %v1007_v13  ;;  %v437_v33 = vmul.f32 %v841_v24, %v1009_v14  ;;  %v843_v34 = vld [vmem:[%s1000_s18 + $0x3] ss:$0 sm:$0xff]  ;;  %v451_v37 = vmul.f32 %v842_v28, %v1012_v16  ;;  %v440_v39 = vmul.f32 %v840_v23, %v1009_v14  ;;  %v845_v41 = vld [vmem:[%s1000_s18 + $0x4] ss:$0 sm:$0xff]  ;;  %v847_v47 = vld [vmem:[%s1000_s18 + $0x5] ss:$0 sm:$0xff] }
  0x31   : > { %v406_v31 = vsub.f32 %v403_v17, %v405_v22  ;;  %v410_v35 = vadd.f32 %v409_v25, %v408_v21  ;;  %v422_v36 = vsub.f32 %v419_v26, %v421_v27  ;;  %v426_v38 = vadd.f32 %v425_v30, %v424_v29  ;;  %v848_v52 = vld [vmem:[%s995_s10 + $0x6] ss:$0 sm:$0xff]  ;;  %v850_v62 = vld [vmem:[%s995_s10 + $0x7] ss:$0 sm:$0xff] }
  0x32   : > { %v438_v42 = vsub.f32 %v435_v32, %v437_v33  ;;  %v453_v43 = vmul.f32 %v843_v34, %v1017_v20  ;;  %v441_v44 = vmul.f32 %v841_v24, %v1007_v13  ;;  %v456_v45 = vmul.f32 %v842_v28, %v1017_v20  ;;  %v849_v57 = vld [vmem:[%s1000_s18 + $0x6] ss:$0 sm:$0xff]  ;;  %v851_v63 = vld [vmem:[%s1000_s18 + $0x7] ss:$0 sm:$0xff] }
  0x33   : > { %v423_v48 = vadd.f32 %v422_v36, %v406_v31  ;;  %v427_v49 = vadd.f32 %v426_v38, %v410_v35  ;;  %v457_v50 = vmul.f32 %v843_v34, %v1012_v16  ;;  %v467_v51 = vmul.f32 %v844_v40, %v990_v8 }
  0x34   : > { %v454_v53 = vsub.f32 %v451_v37, %v453_v43  ;;  %v442_v54 = vadd.f32 %v441_v44, %v440_v39  ;;  %v469_v55 = vmul.f32 %v845_v41, %v401_v9  ;;  %v481_v56 = vmul.f32 %v846_v46, %v1002_v10 }
  0x35   : > { %v439_v58 = vadd.f32 %v438_v42, %v423_v48  ;;  %v458_v59 = vadd.f32 %v457_v50, %v456_v45  ;;  %v483_v60 = vmul.f32 %v847_v47, %v1004_v11  ;;  %v495_v61 = vmul.f32 %v848_v52, %v1007_v13 }
  0x36   : > { %v443_v0 = vadd.f32 %v442_v54, %v427_v49  ;;  %v470_v1 = vsub.f32 %v467_v51, %v469_v55  ;;  %v497_v2 = vmul.f32 %v849_v57, %v1009_v14  ;;  %v472_v3 = vmul.f32 %v844_v40, %v401_v9 }
  0x37   : > { %v455_v4 = vadd.f32 %v454_v53, %v439_v58  ;;  %v484_v5 = vsub.f32 %v481_v56, %v483_v60  ;;  %v509_v6 = vmul.f32 %v850_v62, %v1012_v16  ;;  %v511_v7 = vmul.f32 %v851_v63, %v1017_v20 }
  0x38   : > { %v459_v12 = vadd.f32 %v458_v59, %v443_v0  ;;  %v498_v15 = vsub.f32 %v495_v61, %v497_v2  ;;  %v473_v17 = vmul.f32 %v845_v41, %v990_v8  ;;  %v486_v18 = vmul.f32 %v846_v46, %v1004_v11 }
  0x39   : > { %460 = vst [vmem:[%s383_s14] sm:$0xff] %v455_v4  ;;  %v485_v19 = vadd.f32 %v484_v5, %v470_v1  ;;  %v512_v21 = vsub.f32 %v509_v6, %v511_v7  ;;  %v487_v22 = vmul.f32 %v847_v47, %v1002_v10  ;;  %v500_v9 = vmul.f32 %v848_v52, %v1009_v14 }
  0x3a   : > { %461 = vst [vmem:[%s389_s15] sm:$0xff] %v459_v12  ;;  %v474_v23 = vadd.f32 %v473_v17, %v472_v3  ;;  %v501_v24 = vmul.f32 %v849_v57, %v1007_v13  ;;  %v514_v25 = vmul.f32 %v850_v62, %v1017_v20  ;;  %v515_v26 = vmul.f32 %v851_v63, %v1012_v16 }
  0x3b   : > { %v499_v8 = vadd.f32 %v498_v15, %v485_v19  ;;  %v488_v27 = vadd.f32 %v487_v22, %v486_v18 }
  0x3c   : > { %v502_v11 = vadd.f32 %v501_v24, %v500_v9  ;;  %v516_v30 = vadd.f32 %v515_v26, %v514_v25 }
  0x3d   : > { %v513_v28 = vadd.f32 %v512_v21, %v499_v8  ;;  %v489_v29 = vadd.f32 %v488_v27, %v474_v23 }
  0x3f   : > { %788 = vst [vmem:[%s383_s14 + $0x8] sm:$0xff] %v513_v28  ;;  %v503_v31 = vadd.f32 %v502_v11, %v489_v29  ;;  %532 = sbr.rel (!%p961_p6) target bundleno = 72 (0x48), region = 116 }
  0x40   : > { %v567_v13 = vld [vmem:[%s383_s14] sm:$0xff] (%p961_p6) }
  0x41   : > { %v517_v10 = vadd.f32 %v516_v30, %v503_v31  ;;  %568 = vst [vmem:[%s536_s25] sm:$0xff] (%p961_p6), %v567_v13 }
  0x43   : > { %789 = vst [vmem:[%s389_s15 + $0x8] sm:$0xff] %v517_v10 }
  0x46   : > { %v569_v14 = vld [vmem:[%s383_s14 + $0x8] sm:$0xff] }
  0x47   : > { %570 = vst [vmem:[%s536_s25 + $0x10] sm:$0xff] %v569_v14 }
  0x48 PF: > { %576 = sbr.rel (!%p961_p6) target bundleno = 80 (0x50), region = 154  ;;  %s793_s26 = sshll.u32 (%p961_p6), %s882_s20, 3  ;;  %v611_v16 = vld [vmem:[%s389_s15] sm:$0xff] (%p961_p6) }
  0x49   : > { %s580_s6 = scalar_lea.vmem (%p961_p6), %s1092_s5, %s793_s26 }
  0x4a   : > { %612 = vst [vmem:[%s580_s6] sm:$0xff] (%p961_p6), %v611_v16 }
  0x4e   : > { %v613_v20 = vld [vmem:[%s389_s15 + $0x8] sm:$0xff] }
  0x4f   : > { %614 = vst [vmem:[%s580_s6 + $0x10] sm:$0xff] %v613_v20 }
  0x50 PF: > { %s16_s22 = sadd.s32 1, %s890_s22   ;;  %s1095_s18 = smov %s878_s19 }
  0x51   : > { %p13_p12 = scmp.ge.s32.totalorder %s16_s22, 4   ;;  %s1096_s19 = smov %s966_s29 }
  0x52   : > { %s1097_s20 = smov %s886_s21  ;;  %s1098_s21 = smov %s1100_s23 }
  0x53   :  { %15 = sbr.rel (!%p13_p12) target bundleno = 3 (0x3), region = 257 }

// kernel: reverse.1
= control target key start
LH: loop header
LB: loop body
LE: loop exit
PB: predicated region body
PF: predicated region fallthrough
CT: control target
= control target key end

     0   :  { %s1352_s0 = inlined_call_operand.vmem [shape: f32[2,4,16,16,7], index: 0, kind: input, shape index: {}]   ;;  %s1353_s1 = inlined_call_operand.vmem [shape: f32[2,4,16,16,7], index: 1, kind: output, shape index: {}]  }
   0x1   :  { %v448_v0 = vld [vmem:[%s1352_s0 + $0x60] sm:$0xff]  ;;  %v451_v2 = vld [vmem:[%s1352_s0 + $0xd0] sm:$0xff]  ;;  %v558_v56 = vld [vmem:[%s1352_s0 + $0x68] sm:$0xff] }
   0x2   :  { %v449_v1 = vld [vmem:[%s1352_s0 + $0x220] sm:$0xff]  ;;  %4 = vst [vmem:[%s1353_s1] sm:$0xff] %v448_v0  ;;  %v453_v3 = vld [vmem:[%s1352_s0 + $0x290] sm:$0xff]  ;;  %v560_v57 = vld [vmem:[%s1352_s0 + $0x228] sm:$0xff] }
   0x3   :  { %450 = vst [vmem:[%s1353_s1 + $0x1c0] sm:$0xff] %v449_v1  ;;  %v455_v4 = vld [vmem:[%s1352_s0 + $0x140] sm:$0xff]  ;;  %v459_v6 = vld [vmem:[%s1352_s0 + $0x1b0] sm:$0xff]  ;;  %v562_v58 = vld [vmem:[%s1352_s0 + $0xd8] sm:$0xff] }
   0x4   :  { %452 = vst [vmem:[%s1353_s1 + $0x70] sm:$0xff] %v451_v2  ;;  %v457_v5 = vld [vmem:[%s1352_s0 + $0x300] sm:$0xff]  ;;  %v461_v7 = vld [vmem:[%s1352_s0 + $0x370] sm:$0xff]  ;;  %v564_v59 = vld [vmem:[%s1352_s0 + $0x298] sm:$0xff] }
   0x5   :  { %454 = vst [vmem:[%s1353_s1 + $0x230] sm:$0xff] %v453_v3  ;;  %v463_v8 = vld [vmem:[%s1352_s0 + $0x50] sm:$0xff]  ;;  %v467_v10 = vld [vmem:[%s1352_s0 + $0xc0] sm:$0xff]  ;;  %v566_v60 = vld [vmem:[%s1352_s0 + $0x148] sm:$0xff] }
   0x6   :  { %456 = vst [vmem:[%s1353_s1 + $0xe0] sm:$0xff] %v455_v4  ;;  %v465_v9 = vld [vmem:[%s1352_s0 + $0x210] sm:$0xff]  ;;  %v469_v11 = vld [vmem:[%s1352_s0 + $0x280] sm:$0xff]  ;;  %v568_v61 = vld [vmem:[%s1352_s0 + $0x308] sm:$0xff] }
   0x7   :  { %458 = vst [vmem:[%s1353_s1 + $0x2a0] sm:$0xff] %v457_v5  ;;  %v471_v12 = vld [vmem:[%s1352_s0 + $0x130] sm:$0xff]  ;;  %v475_v14 = vld [vmem:[%s1352_s0 + $0x1a0] sm:$0xff]  ;;  %v570_v62 = vld [vmem:[%s1352_s0 + $0x1b8] sm:$0xff] }
   0x8   :  { %460 = vst [vmem:[%s1353_s1 + $0x150] sm:$0xff] %v459_v6  ;;  %v473_v13 = vld [vmem:[%s1352_s0 + $0x2f0] sm:$0xff]  ;;  %v477_v15 = vld [vmem:[%s1352_s0 + $0x360] sm:$0xff]  ;;  %v572_v63 = vld [vmem:[%s1352_s0 + $0x378] sm:$0xff] }
   0x9   :  { %462 = vst [vmem:[%s1353_s1 + $0x310] sm:$0xff] %v461_v7  ;;  %v479_v16 = vld [vmem:[%s1352_s0 + $0x40] sm:$0xff]  ;;  %v483_v18 = vld [vmem:[%s1352_s0 + $0xb0] sm:$0xff]  ;;  %v574_v0 = vld [vmem:[%s1352_s0 + $0x58] sm:$0xff] }
   0xa   :  { %464 = vst [vmem:[%s1353_s1 + $0x10] sm:$0xff] %v463_v8  ;;  %v481_v17 = vld [vmem:[%s1352_s0 + $0x200] sm:$0xff]  ;;  %v485_v19 = vld [vmem:[%s1352_s0 + $0x270] sm:$0xff]  ;;  %v576_v1 = vld [vmem:[%s1352_s0 + $0x218] sm:$0xff] }
   0xb   :  { %466 = vst [vmem:[%s1353_s1 + $0x1d0] sm:$0xff] %v465_v9  ;;  %v487_v20 = vld [vmem:[%s1352_s0 + $0x120] sm:$0xff]  ;;  %v491_v22 = vld [vmem:[%s1352_s0 + $0x190] sm:$0xff]  ;;  %v578_v2 = vld [vmem:[%s1352_s0 + $0xc8] sm:$0xff] }
   0xc   :  { %468 = vst [vmem:[%s1353_s1 + $0x80] sm:$0xff] %v467_v10  ;;  %v489_v21 = vld [vmem:[%s1352_s0 + $0x2e0] sm:$0xff]  ;;  %v493_v23 = vld [vmem:[%s1352_s0 + $0x350] sm:$0xff]  ;;  %v580_v3 = vld [vmem:[%s1352_s0 + $0x288] sm:$0xff] }
   0xd   :  { %470 = vst [vmem:[%s1353_s1 + $0x240] sm:$0xff] %v469_v11  ;;  %v495_v24 = vld [vmem:[%s1352_s0 + $0x30] sm:$0xff]  ;;  %v499_v26 = vld [vmem:[%s1352_s0 + $0xa0] sm:$0xff]  ;;  %v582_v4 = vld [vmem:[%s1352_s0 + $0x138] sm:$0xff] }
   0xe   :  { %472 = vst [vmem:[%s1353_s1 + $0xf0] sm:$0xff] %v471_v12  ;;  %v497_v25 = vld [vmem:[%s1352_s0 + $0x1f0] sm:$0xff]  ;;  %v501_v27 = vld [vmem:[%s1352_s0 + $0x260] sm:$0xff]  ;;  %v584_v5 = vld [vmem:[%s1352_s0 + $0x2f8] sm:$0xff] }
   0xf   :  { %474 = vst [vmem:[%s1353_s1 + $0x2b0] sm:$0xff] %v473_v13  ;;  %v503_v28 = vld [vmem:[%s1352_s0 + $0x110] sm:$0xff]  ;;  %v507_v30 = vld [vmem:[%s1352_s0 + $0x180] sm:$0xff]  ;;  %v586_v6 = vld [vmem:[%s1352_s0 + $0x1a8] sm:$0xff] }
  0x10   :  { %476 = vst [vmem:[%s1353_s1 + $0x160] sm:$0xff] %v475_v14  ;;  %v505_v29 = vld [vmem:[%s1352_s0 + $0x2d0] sm:$0xff]  ;;  %v509_v31 = vld [vmem:[%s1352_s0 + $0x340] sm:$0xff]  ;;  %v588_v7 = vld [vmem:[%s1352_s0 + $0x368] sm:$0xff] }
  0x11   :  { %478 = vst [vmem:[%s1353_s1 + $0x320] sm:$0xff] %v477_v15  ;;  %v511_v32 = vld [vmem:[%s1352_s0 + $0x20] sm:$0xff]  ;;  %v515_v34 = vld [vmem:[%s1352_s0 + $0x90] sm:$0xff]  ;;  %v590_v8 = vld [vmem:[%s1352_s0 + $0x48] sm:$0xff] }
  0x12   :  { %480 = vst [vmem:[%s1353_s1 + $0x20] sm:$0xff] %v479_v16  ;;  %v513_v33 = vld [vmem:[%s1352_s0 + $0x1e0] sm:$0xff]  ;;  %v517_v35 = vld [vmem:[%s1352_s0 + $0x250] sm:$0xff]  ;;  %v592_v9 = vld [vmem:[%s1352_s0 + $0x208] sm:$0xff] }
  0x13   :  { %482 = vst [vmem:[%s1353_s1 + $0x1e0] sm:$0xff] %v481_v17  ;;  %v519_v36 = vld [vmem:[%s1352_s0 + $0x100] sm:$0xff]  ;;  %v523_v38 = vld [vmem:[%s1352_s0 + $0x170] sm:$0xff]  ;;  %v594_v10 = vld [vmem:[%s1352_s0 + $0xb8] sm:$0xff] }
  0x14   :  { %484 = vst [vmem:[%s1353_s1 + $0x90] sm:$0xff] %v483_v18  ;;  %v521_v37 = vld [vmem:[%s1352_s0 + $0x2c0] sm:$0xff]  ;;  %v525_v39 = vld [vmem:[%s1352_s0 + $0x330] sm:$0xff]  ;;  %v596_v11 = vld [vmem:[%s1352_s0 + $0x278] sm:$0xff] }
  0x15   :  { %486 = vst [vmem:[%s1353_s1 + $0x250] sm:$0xff] %v485_v19  ;;  %v527_v40 = vld [vmem:[%s1352_s0 + $0x10] sm:$0xff]  ;;  %v531_v42 = vld [vmem:[%s1352_s0 + $0x80] sm:$0xff]  ;;  %v598_v12 = vld [vmem:[%s1352_s0 + $0x128] sm:$0xff] }
  0x16   :  { %488 = vst [vmem:[%s1353_s1 + $0x100] sm:$0xff] %v487_v20  ;;  %v529_v41 = vld [vmem:[%s1352_s0 + $0x1d0] sm:$0xff]  ;;  %v533_v43 = vld [vmem:[%s1352_s0 + $0x240] sm:$0xff]  ;;  %v600_v13 = vld [vmem:[%s1352_s0 + $0x2e8] sm:$0xff] }
  0x17   :  { %490 = vst [vmem:[%s1353_s1 + $0x2c0] sm:$0xff] %v489_v21  ;;  %v535_v44 = vld [vmem:[%s1352_s0 + $0xf0] sm:$0xff]  ;;  %v539_v46 = vld [vmem:[%s1352_s0 + $0x160] sm:$0xff]  ;;  %v602_v14 = vld [vmem:[%s1352_s0 + $0x198] sm:$0xff] }
  0x18   :  { %492 = vst [vmem:[%s1353_s1 + $0x170] sm:$0xff] %v491_v22  ;;  %v537_v45 = vld [vmem:[%s1352_s0 + $0x2b0] sm:$0xff]  ;;  %v541_v47 = vld [vmem:[%s1352_s0 + $0x320] sm:$0xff]  ;;  %v604_v15 = vld [vmem:[%s1352_s0 + $0x358] sm:$0xff] }
  0x19   :  { %494 = vst [vmem:[%s1353_s1 + $0x330] sm:$0xff] %v493_v23  ;;  %v193_v48 = vld [vmem:[%s1352_s0] sm:$0xff]  ;;  %v546_v50 = vld [vmem:[%s1352_s0 + $0x70] sm:$0xff]  ;;  %v606_v16 = vld [vmem:[%s1352_s0 + $0x38] sm:$0xff] }
  0x1a   :  { %496 = vst [vmem:[%s1353_s1 + $0x30] sm:$0xff] %v495_v24  ;;  %v544_v49 = vld [vmem:[%s1352_s0 + $0x1c0] sm:$0xff]  ;;  %v548_v51 = vld [vmem:[%s1352_s0 + $0x230] sm:$0xff]  ;;  %v608_v17 = vld [vmem:[%s1352_s0 + $0x1f8] sm:$0xff] }
  0x1b   :  { %498 = vst [vmem:[%s1353_s1 + $0x1f0] sm:$0xff] %v497_v25  ;;  %v550_v52 = vld [vmem:[%s1352_s0 + $0xe0] sm:$0xff]  ;;  %v554_v54 = vld [vmem:[%s1352_s0 + $0x150] sm:$0xff]  ;;  %v610_v18 = vld [vmem:[%s1352_s0 + $0xa8] sm:$0xff] }
  0x1c   :  { %500 = vst [vmem:[%s1353_s1 + $0xa0] sm:$0xff] %v499_v26  ;;  %v552_v53 = vld [vmem:[%s1352_s0 + $0x2a0] sm:$0xff]  ;;  %v556_v55 = vld [vmem:[%s1352_s0 + $0x310] sm:$0xff]  ;;  %v612_v19 = vld [vmem:[%s1352_s0 + $0x268] sm:$0xff] }
  0x1d   :  { %502 = vst [vmem:[%s1353_s1 + $0x260] sm:$0xff] %v501_v27  ;;  %v614_v20 = vld [vmem:[%s1352_s0 + $0x118] sm:$0xff]  ;;  %v618_v22 = vld [vmem:[%s1352_s0 + $0x188] sm:$0xff] }
  0x1e   :  { %504 = vst [vmem:[%s1353_s1 + $0x110] sm:$0xff] %v503_v28  ;;  %v616_v21 = vld [vmem:[%s1352_s0 + $0x2d8] sm:$0xff]  ;;  %v620_v23 = vld [vmem:[%s1352_s0 + $0x348] sm:$0xff] }
  0x1f   :  { %506 = vst [vmem:[%s1353_s1 + $0x2d0] sm:$0xff] %v505_v29  ;;  %v622_v24 = vld [vmem:[%s1352_s0 + $0x28] sm:$0xff]  ;;  %v626_v26 = vld [vmem:[%s1352_s0 + $0x98] sm:$0xff] }
  0x20   :  { %508 = vst [vmem:[%s1353_s1 + $0x180] sm:$0xff] %v507_v30  ;;  %v624_v25 = vld [vmem:[%s1352_s0 + $0x1e8] sm:$0xff]  ;;  %v628_v27 = vld [vmem:[%s1352_s0 + $0x258] sm:$0xff] }
  0x21   :  { %510 = vst [vmem:[%s1353_s1 + $0x340] sm:$0xff] %v509_v31  ;;  %v630_v28 = vld [vmem:[%s1352_s0 + $0x108] sm:$0xff]  ;;  %v634_v30 = vld [vmem:[%s1352_s0 + $0x178] sm:$0xff] }
  0x22   :  { %512 = vst [vmem:[%s1353_s1 + $0x40] sm:$0xff] %v511_v32  ;;  %v632_v29 = vld [vmem:[%s1352_s0 + $0x2c8] sm:$0xff]  ;;  %v636_v31 = vld [vmem:[%s1352_s0 + $0x338] sm:$0xff] }
  0x23   :  { %514 = vst [vmem:[%s1353_s1 + $0x200] sm:$0xff] %v513_v33  ;;  %v638_v32 = vld [vmem:[%s1352_s0 + $0x18] sm:$0xff] }
  0x24   :  { %516 = vst [vmem:[%s1353_s1 + $0xb0] sm:$0xff] %v515_v34  ;;  %v640_v33 = vld [vmem:[%s1352_s0 + $0x1d8] sm:$0xff]  ;;  %v642_v34 = vld [vmem:[%s1352_s0 + $0x88] sm:$0xff] }
  0x25   :  { %518 = vst [vmem:[%s1353_s1 + $0x270] sm:$0xff] %v517_v35  ;;  %v644_v35 = vld [vmem:[%s1352_s0 + $0x248] sm:$0xff] }
  0x26   :  { %520 = vst [vmem:[%s1353_s1 + $0x120] sm:$0xff] %v519_v36  ;;  %v646_v36 = vld [vmem:[%s1352_s0 + $0xf8] sm:$0xff] }
  0x27   :  { %522 = vst [vmem:[%s1353_s1 + $0x2e0] sm:$0xff] %v521_v37  ;;  %v648_v37 = vld [vmem:[%s1352_s0 + $0x2b8] sm:$0xff] }
  0x28   :  { %524 = vst [vmem:[%s1353_s1 + $0x190] sm:$0xff] %v523_v38  ;;  %v650_v38 = vld [vmem:[%s1352_s0 + $0x168] sm:$0xff] }
  0x29   :  { %526 = vst [vmem:[%s1353_s1 + $0x350] sm:$0xff] %v525_v39  ;;  %v652_v39 = vld [vmem:[%s1352_s0 + $0x328] sm:$0xff] }
  0x2a   :  { %528 = vst [vmem:[%s1353_s1 + $0x50] sm:$0xff] %v527_v40  ;;  %v654_v40 = vld [vmem:[%s1352_s0 + $0x8] sm:$0xff] }
  0x2b   :  { %530 = vst [vmem:[%s1353_s1 + $0x210] sm:$0xff] %v529_v41  ;;  %v656_v41 = vld [vmem:[%s1352_s0 + $0x1c8] sm:$0xff] }
  0x2c   :  { %532 = vst [vmem:[%s1353_s1 + $0xc0] sm:$0xff] %v531_v42  ;;  %v658_v42 = vld [vmem:[%s1352_s0 + $0x78] sm:$0xff] }
  0x2d   :  { %534 = vst [vmem:[%s1353_s1 + $0x280] sm:$0xff] %v533_v43  ;;  %v660_v43 = vld [vmem:[%s1352_s0 + $0x238] sm:$0xff] }
  0x2e   :  { %536 = vst [vmem:[%s1353_s1 + $0x130] sm:$0xff] %v535_v44  ;;  %v662_v44 = vld [vmem:[%s1352_s0 + $0xe8] sm:$0xff] }
  0x2f   :  { %538 = vst [vmem:[%s1353_s1 + $0x2f0] sm:$0xff] %v537_v45  ;;  %v664_v45 = vld [vmem:[%s1352_s0 + $0x2a8] sm:$0xff] }
  0x30   :  { %540 = vst [vmem:[%s1353_s1 + $0x1a0] sm:$0xff] %v539_v46  ;;  %v666_v46 = vld [vmem:[%s1352_s0 + $0x158] sm:$0xff] }
  0x31   :  { %542 = vst [vmem:[%s1353_s1 + $0x360] sm:$0xff] %v541_v47  ;;  %v668_v47 = vld [vmem:[%s1352_s0 + $0x318] sm:$0xff] }
  0x32   :  { %543 = vst [vmem:[%s1353_s1 + $0x60] sm:$0xff] %v193_v48 }
  0x33   :  { %545 = vst [vmem:[%s1353_s1 + $0x220] sm:$0xff] %v544_v49 }
  0x34   :  { %547 = vst [vmem:[%s1353_s1 + $0xd0] sm:$0xff] %v546_v50 }
  0x35   :  { %549 = vst [vmem:[%s1353_s1 + $0x290] sm:$0xff] %v548_v51 }
  0x36   :  { %551 = vst [vmem:[%s1353_s1 + $0x140] sm:$0xff] %v550_v52 }
  0x37   :  { %553 = vst [vmem:[%s1353_s1 + $0x300] sm:$0xff] %v552_v53 }
  0x38   :  { %555 = vst [vmem:[%s1353_s1 + $0x1b0] sm:$0xff] %v554_v54 }
  0x39   :  { %557 = vst [vmem:[%s1353_s1 + $0x370] sm:$0xff] %v556_v55 }
  0x3a   :  { %559 = vst [vmem:[%s1353_s1 + $0x8] sm:$0xff] %v558_v56 }
  0x3b   :  { %561 = vst [vmem:[%s1353_s1 + $0x1c8] sm:$0xff] %v560_v57 }
  0x3c   :  { %563 = vst [vmem:[%s1353_s1 + $0x78] sm:$0xff] %v562_v58 }
  0x3d   :  { %565 = vst [vmem:[%s1353_s1 + $0x238] sm:$0xff] %v564_v59 }
  0x3e   :  { %567 = vst [vmem:[%s1353_s1 + $0xe8] sm:$0xff] %v566_v60 }
  0x3f   :  { %569 = vst [vmem:[%s1353_s1 + $0x2a8] sm:$0xff] %v568_v61 }
  0x40   :  { %571 = vst [vmem:[%s1353_s1 + $0x158] sm:$0xff] %v570_v62 }
  0x41   :  { %573 = vst [vmem:[%s1353_s1 + $0x318] sm:$0xff] %v572_v63 }
  0x42   :  { %575 = vst [vmem:[%s1353_s1 + $0x18] sm:$0xff] %v574_v0 }
  0x43   :  { %577 = vst [vmem:[%s1353_s1 + $0x1d8] sm:$0xff] %v576_v1 }
  0x44   :  { %579 = vst [vmem:[%s1353_s1 + $0x88] sm:$0xff] %v578_v2 }
  0x45   :  { %581 = vst [vmem:[%s1353_s1 + $0x248] sm:$0xff] %v580_v3 }
  0x46   :  { %583 = vst [vmem:[%s1353_s1 + $0xf8] sm:$0xff] %v582_v4 }
  0x47   :  { %585 = vst [vmem:[%s1353_s1 + $0x2b8] sm:$0xff] %v584_v5 }
  0x48   :  { %587 = vst [vmem:[%s1353_s1 + $0x168] sm:$0xff] %v586_v6 }
  0x49   :  { %589 = vst [vmem:[%s1353_s1 + $0x328] sm:$0xff] %v588_v7 }
  0x4a   :  { %591 = vst [vmem:[%s1353_s1 + $0x28] sm:$0xff] %v590_v8 }
  0x4b   :  { %593 = vst [vmem:[%s1353_s1 + $0x1e8] sm:$0xff] %v592_v9 }
  0x4c   :  { %595 = vst [vmem:[%s1353_s1 + $0x98] sm:$0xff] %v594_v10 }
  0x4d   :  { %597 = vst [vmem:[%s1353_s1 + $0x258] sm:$0xff] %v596_v11 }
  0x4e   :  { %599 = vst [vmem:[%s1353_s1 + $0x108] sm:$0xff] %v598_v12 }
  0x4f   :  { %601 = vst [vmem:[%s1353_s1 + $0x2c8] sm:$0xff] %v600_v13 }
  0x50   :  { %603 = vst [vmem:[%s1353_s1 + $0x178] sm:$0xff] %v602_v14 }
  0x51   :  { %605 = vst [vmem:[%s1353_s1 + $0x338] sm:$0xff] %v604_v15 }
  0x52   :  { %607 = vst [vmem:[%s1353_s1 + $0x38] sm:$0xff] %v606_v16 }
  0x53   :  { %609 = vst [vmem:[%s1353_s1 + $0x1f8] sm:$0xff] %v608_v17 }
  0x54   :  { %611 = vst [vmem:[%s1353_s1 + $0xa8] sm:$0xff] %v610_v18 }
  0x55   :  { %613 = vst [vmem:[%s1353_s1 + $0x268] sm:$0xff] %v612_v19 }
  0x56   :  { %615 = vst [vmem:[%s1353_s1 + $0x118] sm:$0xff] %v614_v20 }
  0x57   :  { %617 = vst [vmem:[%s1353_s1 + $0x2d8] sm:$0xff] %v616_v21 }
  0x58   :  { %619 = vst [vmem:[%s1353_s1 + $0x188] sm:$0xff] %v618_v22 }
  0x59   :  { %621 = vst [vmem:[%s1353_s1 + $0x348] sm:$0xff] %v620_v23 }
  0x5a   :  { %623 = vst [vmem:[%s1353_s1 + $0x48] sm:$0xff] %v622_v24 }
  0x5b   :  { %625 = vst [vmem:[%s1353_s1 + $0x208] sm:$0xff] %v624_v25 }
  0x5c   :  { %627 = vst [vmem:[%s1353_s1 + $0xb8] sm:$0xff] %v626_v26 }
  0x5d   :  { %629 = vst [vmem:[%s1353_s1 + $0x278] sm:$0xff] %v628_v27 }
  0x5e   :  { %631 = vst [vmem:[%s1353_s1 + $0x128] sm:$0xff] %v630_v28 }
  0x5f   :  { %633 = vst [vmem:[%s1353_s1 + $0x2e8] sm:$0xff] %v632_v29 }
  0x60   :  { %635 = vst [vmem:[%s1353_s1 + $0x198] sm:$0xff] %v634_v30 }
  0x61   :  { %637 = vst [vmem:[%s1353_s1 + $0x358] sm:$0xff] %v636_v31 }
  0x62   :  { %639 = vst [vmem:[%s1353_s1 + $0x58] sm:$0xff] %v638_v32 }
  0x63   :  { %641 = vst [vmem:[%s1353_s1 + $0x218] sm:$0xff] %v640_v33 }
  0x64   :  { %643 = vst [vmem:[%s1353_s1 + $0xc8] sm:$0xff] %v642_v34 }
  0x65   :  { %645 = vst [vmem:[%s1353_s1 + $0x288] sm:$0xff] %v644_v35 }
  0x66   :  { %647 = vst [vmem:[%s1353_s1 + $0x138] sm:$0xff] %v646_v36 }
  0x67   :  { %649 = vst [vmem:[%s1353_s1 + $0x2f8] sm:$0xff] %v648_v37 }
  0x68   :  { %651 = vst [vmem:[%s1353_s1 + $0x1a8] sm:$0xff] %v650_v38 }
  0x69   :  { %653 = vst [vmem:[%s1353_s1 + $0x368] sm:$0xff] %v652_v39 }
  0x6a   :  { %655 = vst [vmem:[%s1353_s1 + $0x68] sm:$0xff] %v654_v40 }
  0x6b   :  { %657 = vst [vmem:[%s1353_s1 + $0x228] sm:$0xff] %v656_v41 }
  0x6c   :  { %659 = vst [vmem:[%s1353_s1 + $0xd8] sm:$0xff] %v658_v42 }
  0x6d   :  { %661 = vst [vmem:[%s1353_s1 + $0x298] sm:$0xff] %v660_v43 }
  0x6e   :  { %663 = vst [vmem:[%s1353_s1 + $0x148] sm:$0xff] %v662_v44 }
  0x6f   :  { %665 = vst [vmem:[%s1353_s1 + $0x308] sm:$0xff] %v664_v45 }
  0x70   :  { %667 = vst [vmem:[%s1353_s1 + $0x1b8] sm:$0xff] %v666_v46 }
  0x71   :  { %669 = vst [vmem:[%s1353_s1 + $0x378] sm:$0xff] %v668_v47 }

</bundles_post_ra>
